<compile_context>
chip_gen: v7x
topology: tpu7x:2x2x1
jax: 0.10.0
libtpu: 0.0.40
codegen_flags: <defaults>
</compile_context>

<pallas_src>
import jax
import jax.numpy as jnp
import numpy as np
from jax.experimental import pallas as pl
from jax.experimental.pallas import tpu as pltpu


# ---------------------------------------------------------------------------
# Fused Pallas kernel: conv(1x1+3x3) + ReLU + spatial-sum (accumulated over a
# P-tiled reduction grid axis) + pooling normalization + FC, all in one call.
# ---------------------------------------------------------------------------
def _fused_scale_regressor_kernel(a_ref, w_ref, b_ref, scale_ref, off_ref,
                                  wfc_ref, bfc_ref, o_ref, acc_ref):
    # a_ref:     (N, tp, K)   bf16 im2col patches for this spatial tile
    # w_ref:     (K, 2*Cm)    bf16 combined [1x1 | 3x3] conv weights
    # b_ref:     (1, 2*Cm)    f32 combined conv bias
    # scale_ref: (1, 2*Cm)    f32 avg-pool scale per feature column
    # off_ref:   (1, 2*Cm)    f32 avg-pool offset (1x1-branch border correction)
    # wfc_ref:   (2*Cm, O)    f32 FC weights for this level
    # bfc_ref:   (1, O)       f32 FC bias (zeros for levels > 0)
    # o_ref:     (N, O)       f32 output (written on the last grid step)
    # acc_ref:   (N, 2*Cm)    f32 VMEM accumulator of per-sample spatial sums
    p = pl.program_id(0)
    N, tp, K = a_ref.shape
    O2 = w_ref.shape[1]

    @pl.when(p == 0)
    def _init():
        acc_ref[...] = jnp.zeros_like(acc_ref)

    w = w_ref[...]
    b = b_ref[...]
    if tp % 8 == 0:
        # Fold the batch into the MXU M dimension: one (N*tp, K) x (K, 2*Cm) matmul.
        z = jnp.dot(a_ref[...].reshape(N * tp, K), w,
                    preferred_element_type=jnp.float32)            # (N*tp, 2Cm) f32
        z = jnp.maximum(z + b, 0.0)
        acc_ref[...] += jnp.sum(z.reshape(N, tp, O2), axis=1)       # (N, 2Cm)
    else:
        # Fallback for spatial sizes not divisible by the sublane tile.
        sums = []
        for n in range(N):
            z = jnp.dot(a_ref[n], w, preferred_element_type=jnp.float32)
            z = jnp.maximum(z + b, 0.0)
            sums.append(jnp.sum(z, axis=0, keepdims=True))          # (1, 2Cm)
        acc_ref[...] += jnp.concatenate(sums, axis=0)

    @pl.when(p == pl.num_programs(0) - 1)
    def _finalize():
        feat = acc_ref[...] * scale_ref[...] + off_ref[...]         # (N, 2Cm)
        o_ref[...] = (jnp.dot(feat, wfc_ref[...],
                              preferred_element_type=jnp.float32)
                      + bfc_ref[...])                               # (N, O)


def _choose_tp(P, max_rows):
    """Largest multiple-of-8 divisor of P that is <= max_rows (or P itself)."""
    if P <= max_rows:
        return P
    for tp in range(min(max_rows, P), 7, -1):
        if P % tp == 0 and tp % 8 == 0:
            return tp
    return P


def fused_conv_pool_fc(patches, w_comb, b_comb, scale, offset, wfc, bfc,
                       max_tile_rows=512):
    """patches: (N, P, K) bf16; w_comb: (K, 2*Cm) bf16; rest f32.

    Returns (N, out_vals) = ((relu(patches @ w_comb + b).sum over P) * scale
                             + offset) @ wfc + bfc.
    """
    N, P, K = patches.shape
    O2 = w_comb.shape[1]
    out_vals = wfc.shape[1]
    tp = _choose_tp(P, max_tile_rows)
    grid = (P // tp,)

    return pl.pallas_call(
        _fused_scale_regressor_kernel,
        out_shape=jax.ShapeDtypeStruct((N, out_vals), jnp.float32),
        grid_spec=pltpu.PrefetchScalarGridSpec(
            num_scalar_prefetch=0,
            grid=grid,
            in_specs=[
                pl.BlockSpec((N, tp, K), lambda p: (0, p, 0)),     # patches tile
                pl.BlockSpec((K, O2), lambda p: (0, 0)),           # w_comb
                pl.BlockSpec((1, O2), lambda p: (0, 0)),           # b_comb
                pl.BlockSpec((1, O2), lambda p: (0, 0)),           # scale
                pl.BlockSpec((1, O2), lambda p: (0, 0)),           # offset
                pl.BlockSpec((O2, out_vals), lambda p: (0, 0)),    # wfc
                pl.BlockSpec((1, out_vals), lambda p: (0, 0)),     # bfc
            ],
            out_specs=pl.BlockSpec((N, out_vals), lambda p: (0, 0)),
            scratch_shapes=[pltpu.VMEM((N, O2), jnp.float32)],
        ),
        compiler_params=pltpu.CompilerParams(
            dimension_semantics=("arbitrary",),     # P axis is a reduction
            vmem_limit_bytes=32 << 20,
        ),
    )(patches, w_comb, b_comb.reshape(1, O2), scale.reshape(1, O2),
      offset.reshape(1, O2), wfc, bfc.reshape(1, out_vals))


# ---------------------------------------------------------------------------
# Host-side glue (im2col, pooling normalization, parameter packing)
# ---------------------------------------------------------------------------
def im2col_3x3(x):
    """x: (N, C, H, W) NCHW, zero pad=1 -> patches (N, H*W, C*9), flattened
    C-major then (dy,dx), matching torch (Cm, C, 3, 3).reshape(Cm, C*9)."""
    N, C, H, W = x.shape
    xp = jnp.pad(x, ((0, 0), (0, 0), (1, 1), (1, 1)))
    cols = []
    for dy in range(3):
        for dx in range(3):
            cols.append(xp[:, :, dy:dy + H, dx:dx + W])            # (N, C, H, W)
    patches = jnp.stack(cols, axis=2)                              # (N, C, 9, H, W)
    patches = patches.reshape(N, C * 9, H * W)
    return jnp.transpose(patches, (0, 2, 1))                       # (N, H*W, C*9)


def pack_params(w1_t, b1, w3_t, b3, wfc_t, bfc):
    """Pack torch-layout parameters into the fused-kernel layout."""
    Cm, C = w1_t.shape[0], w1_t.shape[1]
    w3_mat = w3_t.reshape(Cm, C * 9).T.astype(jnp.float32)         # (C*9, Cm)
    w1_mat = jnp.zeros((C * 9, Cm), jnp.float32)
    center_rows = jnp.arange(C) * 9 + 4                            # tap (dy,dx)=(1,1)
    w1_mat = w1_mat.at[center_rows].set(w1_t.reshape(Cm, C).T)
    # Column order [1x1 | 3x3] matches torch's cat([pool1, pool3]) feature order.
    w_comb = jnp.concatenate([w1_mat, w3_mat], axis=1).astype(jnp.bfloat16)
    b_comb = jnp.concatenate([b1, b3]).astype(jnp.float32)
    return {
        'w_comb': w_comb,                       # (C*9, 2*Cm) bf16
        'b_comb': b_comb,                       # (2*Cm,)     f32
        'b1': b1.astype(jnp.float32),           # for the border correction
        'wfc': wfc_t.T.astype(jnp.float32),     # (F, out_vals)
        'bfc': bfc.astype(jnp.float32),         # (out_vals,)
        'Cm': int(Cm),
    }


def scale_regressor_forward(x_levels, params, out_type='none', max_tile_rows=512):
    """x_levels: list of (N, C, H, W) arrays (like the torch module's input)."""
    Cm = params['Cm']
    out = None
    for li, x in enumerate(x_levels):
        N, C, H, W = x.shape
        patches = im2col_3x3(x).astype(jnp.bfloat16)               # (N, H*W, C*9)

        # Pooling normalization:
        #  - 1x1 branch: Conv2d(padding=1) output is (H+2, W+2); border pixels are
        #    exactly relu(b1)  =>  pool1 = (sum_interior + n_border*relu(b1))/n_full
        #  - 3x3 branch: pool3 = sum / (H*W)
        n_int = H * W
        n_full = (H + 2) * (W + 2)
        n_border = n_full - n_int
        scale = jnp.concatenate([
            jnp.full((Cm,), 1.0 / n_full, jnp.float32),
            jnp.full((Cm,), 1.0 / n_int, jnp.float32)])
        offset = jnp.concatenate([
            (n_border / n_full) * jnp.maximum(params['b1'], 0.0),
            jnp.zeros((Cm,), jnp.float32)])

        wfc_l = params['wfc'][li * 2 * Cm:(li + 1) * 2 * Cm]       # (2*Cm, out_vals)
        bfc_l = params['bfc'] if li == 0 else jnp.zeros_like(params['bfc'])

        out_l = fused_conv_pool_fc(patches, params['w_comb'], params['b_comb'],
                                   scale, offset, wfc_l, bfc_l,
                                   max_tile_rows=max_tile_rows)    # (N, out_vals)
        out = out_l if out is None else out + out_l

    if out_type == 'tanh':
        out = jnp.tanh(out)
    elif out_type == 'sigmoid':
        out = jax.nn.sigmoid(out)
    return out


# ---------------------------------------------------------------------------
# Pure-JAX reference (for correctness check only)
# ---------------------------------------------------------------------------
def reference_forward(x_levels, w1_t, b1, w3_t, b3, wfc_t, bfc):
    feats = []
    for x in x_levels:
        y1 = jax.lax.conv_general_dilated(
            x, w1_t, (1, 1), [(1, 1), (1, 1)],
            dimension_numbers=('NCHW', 'OIHW', 'NCHW')) + b1[None, :, None, None]
        y1 = jnp.maximum(y1, 0.0).mean(axis=(2, 3))
        y3 = jax.lax.conv_general_dilated(
            x, w3_t, (1, 1), [(1, 1), (1, 1)],
            dimension_numbers=('NCHW', 'OIHW', 'NCHW')) + b3[None, :, None, None]
        y3 = jnp.maximum(y3, 0.0).mean(axis=(2, 3))
        feats.append(jnp.concatenate([y1, y3], axis=1))
    f = jnp.concatenate(feats, axis=1)
    return f @ wfc_t.T + bfc[None, :]


# ---------------------------------------------------------------------------
if __name__ == "__main__":
    # Shapes consistent with the module: batch=2, in_channels=4, spatial=16,
    # intermed_channels=32, out_vals=1, filters=[1,3], num_levels=1.
    N, C, H, W = 2, 4, 16, 16
    Cm, out_vals = 32, 1
    num_levels = 1
    F = 2 * num_levels * Cm

    key = jax.random.PRNGKey(0)
    k1, k2, k3, k4, k5, k6, k7 = jax.random.split(key, 7)
    w1_t = jax.random.normal(k1, (Cm, C, 1, 1), jnp.float32) / np.sqrt(C)
    b1 = 0.1 * jax.random.normal(k2, (Cm,), jnp.float32)
    w3_t = jax.random.normal(k3, (Cm, C, 3, 3), jnp.float32) / np.sqrt(C * 9)
    b3 = 0.1 * jax.random.normal(k4, (Cm,), jnp.float32)
    wfc_t = jax.random.normal(k5, (out_vals, F), jnp.float32) / np.sqrt(F)
    bfc = 0.1 * jax.random.normal(k6, (out_vals,), jnp.float32)
    x = jax.random.normal(k7, (N, C, H, W), jnp.float32)

    params = pack_params(w1_t, b1, w3_t, b3, wfc_t, bfc)
    x_levels = [x]   # num_levels = 1 (module forward takes a list of levels)

    # max_tile_rows=128 so the multi-step P-reduction/accumulator path is
    # exercised at this small spatial size; for real images raise it (512-2048
    # on v5e/v6e 128 MiB VMEM, smaller on v7x 64 MiB VMEM).
    out = scale_regressor_forward(x_levels, params, out_type='none',
                                  max_tile_rows=128)
    out = jax.block_until_ready(out)

    ref = jax.block_until_ready(
        reference_forward(x_levels, w1_t, b1, w3_t, b3, wfc_t, bfc))
    # bf16 MXU inputs -> loosened tolerance vs the f32 reference.
    np.testing.assert_allclose(np.asarray(out), np.asarray(ref),
                               rtol=2e-2, atol=5e-3)
    print("KERNEL_OK")
</pallas_src>

<mosaic_0001>
module attributes {stable_mosaic.version = 11 : i64} {
  func.func @_fused_scale_regressor_kernel(%arg0: i32, %arg1: memref<2x128x36xbf16, #tpu.memory_space<vmem>>, %arg2: memref<36x64xbf16, #tpu.memory_space<vmem>>, %arg3: memref<1x64xf32, #tpu.memory_space<vmem>>, %arg4: memref<1x64xf32, #tpu.memory_space<vmem>>, %arg5: memref<1x64xf32, #tpu.memory_space<vmem>>, %arg6: memref<64x1xf32, #tpu.memory_space<vmem>>, %arg7: memref<1x1xf32, #tpu.memory_space<vmem>>, %arg8: memref<2x1xf32, #tpu.memory_space<vmem>>, %arg9: memref<2x64xf32, #tpu.memory_space<vmem>>) attributes {dimension_semantics = [#tpu.dimension_semantics<arbitrary>], iteration_bounds = array<i64: 2>, scalar_prefetch = 0 : i64, scratch_operands = 1 : i64, tpu.core_type = #tpu.core_type<tc>, window_params = [{transform_indices = @transform_0, window_bounds = array<i64: 2, 128, 36>}, {pipeline_mode = #tpu.pipeline_mode<synchronous>, transform_indices = @transform_1, window_bounds = array<i64: 36, 64>}, {pipeline_mode = #tpu.pipeline_mode<synchronous>, transform_indices = @transform_2, window_bounds = array<i64: 1, 64>}, {pipeline_mode = #tpu.pipeline_mode<synchronous>, transform_indices = @transform_3, window_bounds = array<i64: 1, 64>}, {pipeline_mode = #tpu.pipeline_mode<synchronous>, transform_indices = @transform_4, window_bounds = array<i64: 1, 64>}, {pipeline_mode = #tpu.pipeline_mode<synchronous>, transform_indices = @transform_5, window_bounds = array<i64: 64, 1>}, {pipeline_mode = #tpu.pipeline_mode<synchronous>, transform_indices = @transform_6, window_bounds = array<i64: 1, 1>}, {pipeline_mode = #tpu.pipeline_mode<synchronous>, transform_indices = @transform_7, window_bounds = array<i64: 2, 1>}]} {
    %c0_i32 = arith.constant 0 : i32
    %0 = arith.cmpi eq, %arg0, %c0_i32 : i32
    %1 = arith.extui %0 : i1 to i32
    %c0_i32_0 = arith.constant 0 : i32
    %2 = arith.cmpi ne, %1, %c0_i32_0 : i32
    scf.if %2 {
      %cst_14 = arith.constant 0.000000e+00 : f32
      %20 = vector.broadcast %cst_14 : f32 to vector<2x64xf32>
      %c0_15 = arith.constant 0 : index
      %c0_16 = arith.constant 0 : index
      %21 = vector.load %arg9[%c0_15, %c0_16] : memref<2x64xf32, #tpu.memory_space<vmem>>, vector<2x64xf32>
      tpu.vector_store %arg9[%c0_15, %c0_16], %20 {strides = array<i32>} : memref<2x64xf32, #tpu.memory_space<vmem>>, vector<2x64xf32>,
    } else {
    }
    %c0 = arith.constant 0 : index
    %c0_1 = arith.constant 0 : index
    %3 = vector.load %arg2[%c0, %c0_1] : memref<36x64xbf16, #tpu.memory_space<vmem>>, vector<36x64xbf16>
    %c0_2 = arith.constant 0 : index
    %c0_3 = arith.constant 0 : index
    %4 = vector.load %arg3[%c0_2, %c0_3] : memref<1x64xf32, #tpu.memory_space<vmem>>, vector<1x64xf32>
    %c0_4 = arith.constant 0 : index
    %c0_5 = arith.constant 0 : index
    %c0_6 = arith.constant 0 : index
    %5 = vector.load %arg1[%c0_4, %c0_5, %c0_6] : memref<2x128x36xbf16, #tpu.memory_space<vmem>>, vector<2x128x36xbf16>
    %6 = vector.shape_cast %5 : vector<2x128x36xbf16> to vector<256x36xbf16>
    %cst = arith.constant dense<0.000000e+00> : vector<256x64xf32>
    %7 = tpu.matmul %6, %3, %cst {dimension_numbers = #tpu.dot_dimension_numbers<[1], [0], [0], [1], [0, 0, 1, 1], [], []>} : vector<256x36xbf16>, vector<36x64xbf16>, vector<256x64xf32> -> vector<256x64xf32>
    %8 = vector.broadcast %4 : vector<1x64xf32> to vector<256x64xf32>
    %9 = arith.addf %7, %8 : vector<256x64xf32>
    %cst_7 = arith.constant 0.000000e+00 : f32
    %10 = vector.broadcast %cst_7 : f32 to vector<256x64xf32>
    %11 = arith.maximumf %9, %10 : vector<256x64xf32>
    %c0_8 = arith.constant 0 : index
    %c0_9 = arith.constant 0 : index
    %12 = vector.load %arg9[%c0_8, %c0_9] : memref<2x64xf32, #tpu.memory_space<vmem>>, vector<2x64xf32>
    %13 = vector.shape_cast %11 : vector<256x64xf32> to vector<2x128x64xf32>
    %cst_10 = arith.constant dense<0.000000e+00> : vector<2x64xf32>
    %14 = vector.multi_reduction <add>, %13, %cst_10 [1] : vector<2x128x64xf32> to vector<2x64xf32>
    %15 = arith.addf %12, %14 : vector<2x64xf32>
    %c0_11 = arith.constant 0 : index
    %c0_12 = arith.constant 0 : index
    %16 = vector.load %arg9[%c0_11, %c0_12] : memref<2x64xf32, #tpu.memory_space<vmem>>, vector<2x64xf32>
    tpu.vector_store %arg9[%c0_11, %c0_12], %15 {strides = array<i32>} : memref<2x64xf32, #tpu.memory_space<vmem>>, vector<2x64xf32>,
    %c1_i32 = arith.constant 1 : i32
    %17 = arith.cmpi eq, %arg0, %c1_i32 : i32
    %18 = arith.extui %17 : i1 to i32
    %c0_i32_13 = arith.constant 0 : i32
    %19 = arith.cmpi ne, %18, %c0_i32_13 : i32
    scf.if %19 {
      %c0_14 = arith.constant 0 : index
      %c0_15 = arith.constant 0 : index
      %20 = vector.load %arg9[%c0_14, %c0_15] : memref<2x64xf32, #tpu.memory_space<vmem>>, vector<2x64xf32>
      %c0_16 = arith.constant 0 : index
      %c0_17 = arith.constant 0 : index
      %21 = vector.load %arg4[%c0_16, %c0_17] : memref<1x64xf32, #tpu.memory_space<vmem>>, vector<1x64xf32>
      %22 = vector.broadcast %21 : vector<1x64xf32> to vector<2x64xf32>
      %23 = arith.mulf %20, %22 : vector<2x64xf32>
      %c0_18 = arith.constant 0 : index
      %c0_19 = arith.constant 0 : index
      %24 = vector.load %arg5[%c0_18, %c0_19] : memref<1x64xf32, #tpu.memory_space<vmem>>, vector<1x64xf32>
      %25 = vector.broadcast %24 : vector<1x64xf32> to vector<2x64xf32>
      %26 = arith.addf %23, %25 : vector<2x64xf32>
      %c0_20 = arith.constant 0 : index
      %c0_21 = arith.constant 0 : index
      %27 = vector.load %arg6[%c0_20, %c0_21] : memref<64x1xf32, #tpu.memory_space<vmem>>, vector<64x1xf32>
      %cst_22 = arith.constant dense<0.000000e+00> : vector<2x1xf32>
      %28 = tpu.matmul %26, %27, %cst_22 {dimension_numbers = #tpu.dot_dimension_numbers<[1], [0], [0], [1], [0, 0, 1, 1], [], []>} : vector<2x64xf32>, vector<64x1xf32>, vector<2x1xf32> -> vector<2x1xf32>
      %c0_23 = arith.constant 0 : index
      %c0_24 = arith.constant 0 : index
      %29 = vector.load %arg7[%c0_23, %c0_24] : memref<1x1xf32, #tpu.memory_space<vmem>>, vector<1x1xf32>
      %30 = vector.broadcast %29 : vector<1x1xf32> to vector<2x1xf32>
      %31 = arith.addf %28, %30 : vector<2x1xf32>
      %c0_25 = arith.constant 0 : index
      %c0_26 = arith.constant 0 : index
      %32 = vector.load %arg8[%c0_25, %c0_26] : memref<2x1xf32, #tpu.memory_space<vmem>>, vector<2x1xf32>
      tpu.vector_store %arg8[%c0_25, %c0_26], %31 {strides = array<i32>} : memref<2x1xf32, #tpu.memory_space<vmem>>, vector<2x1xf32>,
    } else {
    }
    return
  }
  func.func @transform_0(%arg0: i32) -> (i32, i32, i32) {
    %c0_i32 = arith.constant 0 : i32
    %c0_i32_0 = arith.constant 0 : i32
    %c0_i32_1 = arith.constant 0 : i32
    return %c0_i32, %arg0, %c0_i32_0 : i32, i32, i32
  }
  func.func @transform_1(%arg0: i32) -> (i32, i32) {
    %c0_i32 = arith.constant 0 : i32
    %c0_i32_0 = arith.constant 0 : i32
    %c0_i32_1 = arith.constant 0 : i32
    return %c0_i32, %c0_i32_0 : i32, i32
  }
  func.func @transform_2(%arg0: i32) -> (i32, i32) {
    %c0_i32 = arith.constant 0 : i32
    %c0_i32_0 = arith.constant 0 : i32
    %c0_i32_1 = arith.constant 0 : i32
    return %c0_i32, %c0_i32_0 : i32, i32
  }
  func.func @transform_3(%arg0: i32) -> (i32, i32) {
    %c0_i32 = arith.constant 0 : i32
    %c0_i32_0 = arith.constant 0 : i32
    %c0_i32_1 = arith.constant 0 : i32
    return %c0_i32, %c0_i32_0 : i32, i32
  }
  func.func @transform_4(%arg0: i32) -> (i32, i32) {
    %c0_i32 = arith.constant 0 : i32
    %c0_i32_0 = arith.constant 0 : i32
    %c0_i32_1 = arith.constant 0 : i32
    return %c0_i32, %c0_i32_0 : i32, i32
  }
  func.func @transform_5(%arg0: i32) -> (i32, i32) {
    %c0_i32 = arith.constant 0 : i32
    %c0_i32_0 = arith.constant 0 : i32
    %c0_i32_1 = arith.constant 0 : i32
    return %c0_i32, %c0_i32_0 : i32, i32
  }
  func.func @transform_6(%arg0: i32) -> (i32, i32) {
    %c0_i32 = arith.constant 0 : i32
    %c0_i32_0 = arith.constant 0 : i32
    %c0_i32_1 = arith.constant 0 : i32
    return %c0_i32, %c0_i32_0 : i32, i32
  }
  func.func @transform_7(%arg0: i32) -> (i32, i32) {
    %c0_i32 = arith.constant 0 : i32
    %c0_i32_0 = arith.constant 0 : i32
    %c0_i32_1 = arith.constant 0 : i32
    return %c0_i32, %c0_i32_0 : i32, i32
  }
}

</mosaic_0001>

<bundles_post_ra>
// kernel: tpu_custom_call.1
= control target key start
LH: loop header
LB: loop body
LE: loop exit
PB: predicated region body
PF: predicated region fallthrough
CT: control target
= control target key end

     0   :  { %s1545_s0 = inlined_call_operand.vmem [shape: bf16[2,256,36], index: 0, kind: input, shape index: {}]   ;;  %s1546_s1 = inlined_call_operand.vmem [shape: bf16[36,64], index: 1, kind: input, shape index: {}]   ;;  %s1547_s2 = inlined_call_operand.vmem [shape: f32[1,64], index: 2, kind: input, shape index: {}]   ;;  %s1548_s3 = inlined_call_operand.vmem [shape: f32[1,64], index: 3, kind: input, shape index: {}]   ;;  %s1549_s4 = inlined_call_operand.vmem [shape: f32[1,64], index: 4, kind: input, shape index: {}]   ;;  %s1550_s5 = inlined_call_operand.vmem [shape: f32[64,1], index: 5, kind: input, shape index: {}]   ;;  %s1551_s6 = inlined_call_operand.<no memory space> [shape: f32[1,1], index: 6, kind: input, shape index: {}]   ;;  %s1552_s7 = inlined_call_operand.vmem [shape: f32[2,1], index: 7, kind: output, shape index: {}]  }
   0x1   :  { %v12_v0 = vstv %s1551_s6 }
   0x2   :  { %13 = vst [vmem:[#allocation3] sm:$0x1] %v12_v0 }
   0x3   :  { %s1330_s26 = smov 0   ;;  %s1332_s27 = smov 0  }
   0x4   :  { %s1334_s28 = smov 0  }
   0x5 LB: > { %s1054_s6 = sadd.s32 4294967295, %s1281_s28   ;;  %s1347_s29 = sadd.s32 1, %s1281_s28   ;;  %s1281_s28 = sphi %s1334_s28, %s1555_s28   ;;  %s1277_s27 = sphi %s1332_s27, %s1554_s27   ;;  %s1273_s26 = sphi %s1330_s26, %s1553_s26  }
   0x6   : > { %s23_s30 = ssub.s32 %s1281_s28, %s1347_s29  ;;  %s26_s8 = sadd.s32 1, %s1277_s27 }
   0x7   : > { %p24_p0 = scmp.eq.s32.totalorder %s23_s30, 0  ;;  %p33_p1 = scmp.ne.s32.totalorder %s1277_s27, %s1273_s26 }
   0x8   : > { %p34_p2 = scmp.eq.s32.totalorder %s1281_s28, 0  ;;  %p1056_p4 = scmp.ge.s32.totalorder %s1281_s28, 2 }
   0x9   : > { %s1356_s9 = scalar_select %p24_p0, %s1277_s27, %s26_s8  }
   0xa   : > { %p35_p3 = por %p34_p2, %p33_p1  ;;  %224 = sbr.rel (%p1056_p4) target bundleno = 29 (0x1d), region = 40 }
  0x11   : > { %227 = sbr.rel (!%p35_p3) target bundleno = 29 (0x1d), region = 44  ;;  %s229_s10 = sand.u32 (%p35_p3), 1, %s1277_s27  }
  0x12   : > { %s1106_s11 = sshll.u32 (%p35_p3), %s1281_s28, 6  ;;  %s1057_s12 = sshll.u32 (%p35_p3), %s229_s10, 7 }
  0x13   : > { %s1364_s15 = scalar_lea.vmem (%p35_p3), %s1545_s0, %s1106_s11  ;;  %s231_s16 = scalar_lea.vmem (%p35_p3), [#allocation4], %s1057_s12 }
  0x14   : > { %v250_v1 = vld [vmem:[%s1364_s15] sm:$0xff] (%p35_p3)   ;;  %v254_v2 = vld [vmem:[%s1364_s15 + $0x8] sm:$0xff] (%p35_p3)   ;;  %v258_v3 = vld [vmem:[%s1364_s15 + $0x10] sm:$0xff] (%p35_p3)  }
  0x15   : > { %251 = vst [vmem:[%s231_s16] sm:$0xff] (%p35_p3), %v250_v1   ;;  %255 = vst [vmem:[%s231_s16 + $0x8] sm:$0xff] (%p35_p3), %v254_v2   ;;  %v262_v4 = vld [vmem:[%s1364_s15 + $0x18] sm:$0xff] (%p35_p3)   ;;  %v266_v5 = vld [vmem:[%s1364_s15 + $0x20] sm:$0xff] (%p35_p3)  }
  0x16   : > { %259 = vst [vmem:[%s231_s16 + $0x10] sm:$0xff] (%p35_p3), %v258_v3   ;;  %v270_v6 = vld [vmem:[%s1364_s15 + $0x28] sm:$0xff] (%p35_p3)   ;;  %263 = vst [vmem:[%s231_s16 + $0x18] sm:$0xff] (%p35_p3), %v262_v4   ;;  %v274_v7 = vld [vmem:[%s1364_s15 + $0x30] sm:$0xff] (%p35_p3)  }
  0x17   : > { %267 = vst [vmem:[%s231_s16 + $0x20] sm:$0xff] (%p35_p3), %v266_v5   ;;  %271 = vst [vmem:[%s231_s16 + $0x28] sm:$0xff] (%p35_p3), %v270_v6   ;;  %v278_v8 = vld [vmem:[%s1364_s15 + $0x38] sm:$0xff] (%p35_p3)   ;;  %v282_v9 = vld [vmem:[%s1364_s15 + $0x80] sm:$0xff] (%p35_p3)  }
  0x18   : > { %275 = vst [vmem:[%s231_s16 + $0x30] sm:$0xff] %v274_v7   ;;  %279 = vst [vmem:[%s231_s16 + $0x38] sm:$0xff] %v278_v8   ;;  %v286_v10 = vld [vmem:[%s1364_s15 + $0x88] sm:$0xff]   ;;  %v290_v11 = vld [vmem:[%s1364_s15 + $0x90] sm:$0xff]  }
  0x19   : > { %283 = vst [vmem:[%s231_s16 + $0x40] sm:$0xff] %v282_v9   ;;  %v294_v12 = vld [vmem:[%s1364_s15 + $0x98] sm:$0xff]   ;;  %287 = vst [vmem:[%s231_s16 + $0x48] sm:$0xff] %v286_v10   ;;  %v298_v13 = vld [vmem:[%s1364_s15 + $0xa0] sm:$0xff]  }
  0x1a   : > { %291 = vst [vmem:[%s231_s16 + $0x50] sm:$0xff] %v290_v11   ;;  %295 = vst [vmem:[%s231_s16 + $0x58] sm:$0xff] %v294_v12   ;;  %v302_v14 = vld [vmem:[%s1364_s15 + $0xa8] sm:$0xff]   ;;  %v306_v15 = vld [vmem:[%s1364_s15 + $0xb0] sm:$0xff]  }
  0x1b   : > { %299 = vst [vmem:[%s231_s16 + $0x60] sm:$0xff] %v298_v13   ;;  %303 = vst [vmem:[%s231_s16 + $0x68] sm:$0xff] %v302_v14   ;;  %v310_v16 = vld [vmem:[%s1364_s15 + $0xb8] sm:$0xff]  }
  0x1c   : > { %307 = vst [vmem:[%s231_s16 + $0x70] sm:$0xff] %v306_v15   ;;  %311 = vst [vmem:[%s231_s16 + $0x78] sm:$0xff] %v310_v16  }
  0x1d PF: > { %p1060_p5 = scmp.ge.s32.totalorder %s1281_s28, 1  ;;  %p399_p6 = scmp.lt.s32.totalorder %s1281_s28, 3 }
  0x1f   : > { %p400_p7 = pnand %p1060_p5, %p399_p6 }
  0x20   : > { %s406_s17 = sand.u32 (!%p400_p7), 1, %s1273_s26   ;;  %p1062_p8 = scmp.ne.s32.totalorder (!%p400_p7), %s1054_s6, 0 }
  0x21   : > { %403 = sbr.rel (%p400_p7) target bundleno = 553 (0x229), region = 85  ;;  %s1061_s18 = sshll.u32 (!%p400_p7), %s406_s17, 7 }
  0x22   : > { %s1385_s19 = scalar_lea.vmem (!%p400_p7), [#allocation4], %s1061_s18 }
  0x28   : > { %437 = sbr.rel (%p1062_p8) target bundleno = 47 (0x2f), region = 93  ;;  %vm438_vm0 = vcmask (!%p1062_p8), 517120   ;;  %v1283_v17 = vmov (!%p1062_p8), 0.0  }
  0x29   : > { %439 = vst.msk [vmem:[#allocation2] sm:$0x3] (!%p1062_p8), %vm438_vm0, %v1283_v17 }
  0x2f PF: > { %v1240_v18 = vld [vmem:[%s1546_s1] sm:$0xff]   ;;  %v1241_v19 = vld [vmem:[%s1546_s1 + $0x8] sm:$0xff]   ;;  %vm579_vm1 = vcmask 293888   ;;  %v1242_v20 = vld [vmem:[%s1546_s1 + $0x10] ss:$0 sps:$4 sm:$0x33]  }
  0x30   : > { %1135 = vmatprep.subr.bf16.mxu0 %v1240_v18  ;;  %1204 = vmatprep.subr.bf16.mxu1 %v1240_v18  ;;  %v1243_v21 = vld [vmem:[%s1385_s19] sm:$0xff]   ;;  %vm628_vm2 = vcmask 1041408   ;;  %v1245_v24 = vld [vmem:[%s1385_s19 + $0x8] sm:$0xff]   ;;  %v1247_v26 = vld [vmem:[%s1385_s19 + $0x10] sm:$0xff]   ;;  %vm826_vm3 = vcmask 523264   ;;  %vm903_vm4 = vcmask 1041409  }
  0x31   : > { %1136 = vmatpush3.bf16.msra.mxu0 %v1240_v18  ;;  %1207 = vmatpush3.bf16.msra.mxu1 %v1240_v18  ;;  %v1244_v22 = vld [vmem:[%s1385_s19 + $0x40] sm:$0xff]   ;;  %v630_v23 = vsel %vm628_vm2, %v1242_v20, 0  ;;  %v1246_v25 = vld [vmem:[%s1385_s19 + $0x48] sm:$0xff]   ;;  %v1248_v27 = vld [vmem:[%s1385_s19 + $0x50] sm:$0xff]   ;;  %vm907_vm5 = vcmask 517120   ;;  %p1099_p9 = scmp.ne.s32.totalorder %s1054_s6, 1 }
  0x32   : > { %1137 = vmatprep.subr.bf16.mxu0 %v1241_v19  ;;  %1205 = vmatprep.subr.bf16.mxu1 %v1241_v19  ;;  %v1249_v28 = vld [vmem:[%s1385_s19 + $0x18] sm:$0xff]   ;;  %v1251_v30 = vld [vmem:[%s1385_s19 + $0x20] sm:$0xff]   ;;  %v1253_v32 = vld [vmem:[%s1385_s19 + $0x28] sm:$0xff]   ;;  %vm1285_vm6 = vmmov (!%p1099_p9), 0   ;;  %vm1018_vm7 = vcmask (!%p1099_p9), 1024  }
  0x33   : > { %1141 = vmatprep.mubr.msk.bf16.mxu0 %vm579_vm1, %v1243_v21  ;;  %1157 = vmatprep.mubr.msk.bf16.mxu1 %vm579_vm1, %v1244_v22  ;;  %v1250_v29 = vld [vmem:[%s1385_s19 + $0x58] sm:$0xff]   ;;  %v1252_v31 = vld [vmem:[%s1385_s19 + $0x60] sm:$0xff]   ;;  %v1254_v33 = vld [vmem:[%s1385_s19 + $0x68] sm:$0xff]  }
  0x34   : > { %v1255_v34 = vld [vmem:[%s1385_s19 + $0x30] sm:$0xff]   ;;  %v1257_v36 = vld [vmem:[%s1385_s19 + $0x38] sm:$0xff]  }
  0x35   : > { %1138 = vmatpush3.bf16.msra.mxu0 %v1241_v19  ;;  %1208 = vmatpush3.bf16.msra.mxu1 %v1241_v19  ;;  %v1256_v35 = vld [vmem:[%s1385_s19 + $0x70] sm:$0xff]   ;;  %v1258_v37 = vld [vmem:[%s1385_s19 + $0x78] sm:$0xff]  }
  0x36   : > { %1210 = vmatprep.subr.msk.bf16.mxu0 %vm628_vm2, %v1242_v20  ;;  %1211 = vmatprep.subr.msk.bf16.mxu1 %vm628_vm2, %v1242_v20  ;;  %v1433_v38 = vld [vmem:[%s1547_s2] ss:$0 sm:$0xff] }
  0x39   : > { %1140 = vmatpush3.bf16.msra.mxu0 %v630_v23  ;;  %1209 = vmatpush3.bf16.msra.mxu1 %v630_v23 }
  0x3c   : > { %1142 = vmatmul.mubr.msk.bf16.vlgmr.msra.gmra.mrb[0].mxu0 %vm579_vm1, %v1245_v24  ;;  %1158 = vmatmul.mubr.msk.bf16.vlgmr.msra.gmra.mrb[0].mxu1 %vm579_vm1, %v1246_v25 }
  0x3d   : > { %1145 = vmatprep.mubr.msk.bf16.mxu0 %vm579_vm1, %v1247_v26  ;;  %1161 = vmatprep.mubr.msk.bf16.mxu1 %vm579_vm1, %v1248_v27 }
  0x44   : > { %1146 = vmatmul.mubr.msk.bf16.gmra.mrb[4].mxu0 %vm579_vm1, %v1249_v28  ;;  %1162 = vmatmul.mubr.msk.bf16.gmra.mrb[4].mxu1 %vm579_vm1, %v1250_v29 }
  0x45   : > { %1149 = vmatprep.mubr.msk.bf16.mxu0 %vm579_vm1, %v1251_v30  ;;  %1165 = vmatprep.mubr.msk.bf16.mxu1 %vm579_vm1, %v1252_v31 }
  0x4c   : > { %1150 = vmatmul.mubr.msk.bf16.gmra.mrb[8].mxu0 %vm579_vm1, %v1253_v32  ;;  %1166 = vmatmul.mubr.msk.bf16.gmra.mrb[8].mxu1 %vm579_vm1, %v1254_v33 }
  0x4d   : > { %1153 = vmatprep.mubr.msk.bf16.mxu0 %vm579_vm1, %v1255_v34  ;;  %1169 = vmatprep.mubr.msk.bf16.mxu1 %vm579_vm1, %v1256_v35 }
  0x54   : > { %1154 = vmatmul.mubr.msk.bf16.gmra.mrb[12].mxu0 %vm579_vm1, %v1257_v36  ;;  %1170 = vmatmul.mubr.msk.bf16.gmra.mrb[12].mxu1 %vm579_vm1, %v1258_v37 }
 0x10f   : > { %v1143_v39 = vpop.f32.mrb[0].mxu0  ;;  %v1159_v40 = vpop.f32.mrb[0].mxu1 }
 0x110   : > { %v666_v41 = vpop.f32.mrb[1].mxu0  ;;  %v730_v42 = vpop.f32.mrb[1].mxu1  ;;  %v675_v43 = vadd.f32 %v1143_v39, %v1433_v38  ;;  %v739_v44 = vadd.f32 %v1159_v40, %v1433_v38 }
 0x111   : > { %v667_v45 = vadd.f32 %v1433_v38, %v666_v41  ;;  %v731_v46 = vadd.f32 %v1433_v38, %v730_v42  ;;  %v1144_v47 = vpop.f32.mrb[2].mxu0  ;;  %v1160_v48 = vpop.f32.mrb[2].mxu1 }
 0x112   : > { %v678_v49 = vadd.f32 %v1144_v47, %v1433_v38  ;;  %v742_v50 = vadd.f32 %v1160_v48, %v1433_v38  ;;  %v669_v51 = vpop.f32.mrb[3].mxu0  ;;  %v733_v52 = vpop.f32.mrb[3].mxu1  ;;  %v795_v57 = vmax.f32 %v675_v43, 0.0  ;;  %v811_v58 = vmax.f32 %v739_v44, 0.0 }
 0x113   : > { %v793_v53 = vmax.f32 %v667_v45, 0.0  ;;  %v809_v54 = vmax.f32 %v731_v46, 0.0  ;;  %v670_v55 = vadd.f32 %v1433_v38, %v669_v51  ;;  %v734_v56 = vadd.f32 %v1433_v38, %v733_v52 }
 0x114   : > { %v796_v61 = vmax.f32 %v678_v49, 0.0  ;;  %v812_v62 = vmax.f32 %v742_v50, 0.0  ;;  %v830_v9 = vsel %vm826_vm3, %v795_v57, 0.0  ;;  %v867_v10 = vsel %vm826_vm3, %v811_v58, 0.0 }
 0x115   : > { %v794_v59 = vmax.f32 %v670_v55, 0.0  ;;  %v810_v60 = vmax.f32 %v734_v56, 0.0  ;;  %v827_v63 = vsel %vm826_vm3, %v793_v53, 0.0  ;;  %v864_v0 = vsel %vm826_vm3, %v809_v54, 0.0 }
 0x116   : > { %v832_v15 = vsel %vm826_vm3, %v796_v61, 0.0  ;;  %v869_v16 = vsel %vm826_vm3, %v812_v62, 0.0 }
 0x117   : > { %v828_v1 = vsel %vm826_vm3, %v794_v59, 0.0  ;;  %v865_v2 = vsel %vm826_vm3, %v810_v60, 0.0  ;;  %v1147_v3 = vpop.f32.mrb[4].mxu0  ;;  %v1163_v4 = vpop.f32.mrb[4].mxu1 }
 0x118   : > { %v829_v5 = vadd.f32 %v828_v1, %v827_v63  ;;  %v866_v6 = vadd.f32 %v865_v2, %v864_v0  ;;  %v682_v7 = vpop.f32.mrb[5].mxu0  ;;  %v746_v8 = vpop.f32.mrb[5].mxu1  ;;  %v691_v21 = vadd.f32 %v1147_v3, %v1433_v38  ;;  %v755_v22 = vadd.f32 %v1163_v4, %v1433_v38 }
 0x119   : > { %v683_v11 = vadd.f32 %v1433_v38, %v682_v7  ;;  %v747_v12 = vadd.f32 %v1433_v38, %v746_v8  ;;  %v1148_v13 = vpop.f32.mrb[6].mxu0  ;;  %v1164_v14 = vpop.f32.mrb[6].mxu1 }
 0x11a   : > { %v831_v17 = vadd.f32 %v830_v9, %v829_v5  ;;  %v868_v18 = vadd.f32 %v867_v10, %v866_v6  ;;  %v685_v19 = vpop.f32.mrb[7].mxu0  ;;  %v749_v20 = vpop.f32.mrb[7].mxu1  ;;  %v694_v27 = vadd.f32 %v1148_v13, %v1433_v38  ;;  %v758_v28 = vadd.f32 %v1164_v14, %v1433_v38 }
 0x11b   : > { %v797_v23 = vmax.f32 %v683_v11, 0.0  ;;  %v813_v24 = vmax.f32 %v747_v12, 0.0  ;;  %v686_v33 = vadd.f32 %v1433_v38, %v685_v19  ;;  %v750_v34 = vadd.f32 %v1433_v38, %v749_v20 }
 0x11c   : > { %v833_v25 = vadd.f32 %v832_v15, %v831_v17  ;;  %v870_v26 = vadd.f32 %v869_v16, %v868_v18  ;;  %v799_v35 = vmax.f32 %v691_v21, 0.0  ;;  %v815_v36 = vmax.f32 %v755_v22, 0.0 }
 0x11d   : > { %v834_v29 = vsel %vm826_vm3, %v797_v23, 0.0  ;;  %v871_v30 = vsel %vm826_vm3, %v813_v24, 0.0  ;;  %v800_v40 = vmax.f32 %v694_v27, 0.0  ;;  %v816_v41 = vmax.f32 %v758_v28, 0.0 }
 0x11e   : > { %v835_v31 = vadd.f32 %v834_v29, %v833_v25  ;;  %v872_v32 = vadd.f32 %v871_v30, %v870_v26  ;;  %v798_v42 = vmax.f32 %v686_v33, 0.0  ;;  %v814_v43 = vmax.f32 %v750_v34, 0.0 }
 0x11f   : > { %v1151_v37 = vpop.f32.mrb[8].mxu0  ;;  %v1167_v39 = vpop.f32.mrb[8].mxu1  ;;  %v838_v60 = vsel %vm826_vm3, %v799_v35, 0.0  ;;  %v875_v61 = vsel %vm826_vm3, %v815_v36, 0.0  ;;  %v840_v62 = vsel %vm826_vm3, %v800_v40, 0.0  ;;  %v877_v63 = vsel %vm826_vm3, %v816_v41, 0.0 }
 0x120   : > { %v698_v44 = vpop.f32.mrb[9].mxu0  ;;  %v762_v45 = vpop.f32.mrb[9].mxu1  ;;  %v836_v50 = vsel %vm826_vm3, %v798_v42, 0.0  ;;  %v873_v51 = vsel %vm826_vm3, %v814_v43, 0.0  ;;  %v707_v52 = vadd.f32 %v1151_v37, %v1433_v38  ;;  %v771_v53 = vadd.f32 %v1167_v39, %v1433_v38 }
 0x121   : > { %v699_v46 = vadd.f32 %v1433_v38, %v698_v44  ;;  %v763_v47 = vadd.f32 %v1433_v38, %v762_v45  ;;  %v1152_v48 = vpop.f32.mrb[10].mxu0  ;;  %v1168_v49 = vpop.f32.mrb[10].mxu1  ;;  %v837_v56 = vadd.f32 %v836_v50, %v835_v31  ;;  %v874_v57 = vadd.f32 %v873_v51, %v872_v32 }
 0x122   : > { %v701_v54 = vpop.f32.mrb[11].mxu0  ;;  %v765_v55 = vpop.f32.mrb[11].mxu1  ;;  %v710_v2 = vadd.f32 %v1152_v48, %v1433_v38  ;;  %v774_v3 = vadd.f32 %v1168_v49, %v1433_v38  ;;  %v803_v8 = vmax.f32 %v707_v52, 0.0  ;;  %v819_v9 = vmax.f32 %v771_v53, 0.0 }
 0x123   : > { %v801_v58 = vmax.f32 %v699_v46, 0.0  ;;  %v817_v59 = vmax.f32 %v763_v47, 0.0  ;;  %v839_v0 = vadd.f32 %v838_v60, %v837_v56  ;;  %v876_v1 = vadd.f32 %v875_v61, %v874_v57 }
 0x124   : > { %v702_v6 = vadd.f32 %v1433_v38, %v701_v54  ;;  %v766_v7 = vadd.f32 %v1433_v38, %v765_v55  ;;  %v804_v20 = vmax.f32 %v710_v2, 0.0  ;;  %v820_v21 = vmax.f32 %v774_v3, 0.0 }
 0x125   : > { %v842_v4 = vsel %vm826_vm3, %v801_v58, 0.0  ;;  %v879_v5 = vsel %vm826_vm3, %v817_v59, 0.0  ;;  %v841_v10 = vadd.f32 %v840_v62, %v839_v0  ;;  %v878_v11 = vadd.f32 %v877_v63, %v876_v1 }
 0x126   : > { %v802_v14 = vmax.f32 %v702_v6, 0.0  ;;  %v818_v15 = vmax.f32 %v766_v7, 0.0  ;;  %v846_v30 = vsel %vm826_vm3, %v803_v8, 0.0  ;;  %v883_v31 = vsel %vm826_vm3, %v819_v9, 0.0 }
 0x127   : > { %v1155_v12 = vpop.f32.mrb[12].mxu0  ;;  %v1171_v13 = vpop.f32.mrb[12].mxu1  ;;  %v843_v18 = vadd.f32 %v842_v4, %v841_v10  ;;  %v880_v19 = vadd.f32 %v879_v5, %v878_v11  ;;  %v848_v39 = vsel %vm826_vm3, %v804_v20, 0.0  ;;  %v885_v40 = vsel %vm826_vm3, %v820_v21, 0.0  ;;  %v930_v21 = vld [vmem:[%s1550_s5] sm:$0xff] (!%p1099_p9) }
 0x128   : > { %v714_v16 = vpop.f32.mrb[13].mxu0  ;;  %v778_v17 = vpop.f32.mrb[13].mxu1  ;;  %v844_v24 = vsel %vm826_vm3, %v802_v14, 0.0  ;;  %v881_v25 = vsel %vm826_vm3, %v818_v15, 0.0  ;;  %v723_v34 = vadd.f32 %v1155_v12, %v1433_v38  ;;  %v787_v35 = vadd.f32 %v1171_v13, %v1433_v38 }
 0x129   : > { %v1156_v22 = vpop.f32.mrb[14].mxu0  ;;  %v1172_v23 = vpop.f32.mrb[14].mxu1  ;;  %v715_v26 = vadd.f32 %v1433_v38, %v714_v16  ;;  %v779_v27 = vadd.f32 %v1433_v38, %v778_v17  ;;  %v845_v32 = vadd.f32 %v844_v24, %v843_v18  ;;  %v882_v33 = vadd.f32 %v881_v25, %v880_v19  ;;  %v825_v17 = vld [vmem:[#allocation2] sm:$0x3] }
 0x12a   : > { %v717_v28 = vpop.f32.mrb[15].mxu0  ;;  %v781_v29 = vpop.f32.mrb[15].mxu1  ;;  %v726_v45 = vadd.f32 %v1156_v22, %v1433_v38  ;;  %v790_v46 = vadd.f32 %v1172_v23, %v1433_v38  ;;  %v807_v51 = vmax.f32 %v723_v34, 0.0  ;;  %v823_v52 = vmax.f32 %v787_v35, 0.0  ;;  %v931_v22 = vld [vmem:[%s1550_s5 + $0x8] sm:$0xff] (!%p1099_p9)  ;;  %v932_v23 = vld [vmem:[%s1550_s5 + $0x10] sm:$0xff] (!%p1099_p9) }
 0x12b   : > { %v805_v36 = vmax.f32 %v715_v26, 0.0  ;;  %v821_v37 = vmax.f32 %v779_v27, 0.0  ;;  %v847_v41 = vadd.f32 %v846_v30, %v845_v32  ;;  %v884_v42 = vadd.f32 %v883_v31, %v882_v33  ;;  %v933_v26 = vld [vmem:[%s1550_s5 + $0x18] sm:$0xff] (!%p1099_p9)  ;;  %v935_v30 = vld [vmem:[%s1550_s5 + $0x28] sm:$0xff] (!%p1099_p9)  ;;  %v1100_v33 = vld [vmem:[%s1548_s3] ss:$0 sm:$0xff] (!%p1099_p9) }
 0x12c   : > { %v718_v49 = vadd.f32 %v1433_v38, %v717_v28  ;;  %v782_v50 = vadd.f32 %v1433_v38, %v781_v29  ;;  %v808_v57 = vmax.f32 %v726_v45, 0.0  ;;  %v824_v58 = vmax.f32 %v790_v46, 0.0  ;;  %v934_v29 = vld [vmem:[%s1550_s5 + $0x20] sm:$0xff] (!%p1099_p9)  ;;  %v936_v34 = vld [vmem:[%s1550_s5 + $0x30] sm:$0xff] (!%p1099_p9)  ;;  %v937_v35 = vld [vmem:[%s1550_s5 + $0x38] sm:$0xff] (!%p1099_p9) }
 0x12d   : > { %v850_v43 = vsel %vm826_vm3, %v805_v36, 0.0  ;;  %v887_v44 = vsel %vm826_vm3, %v821_v37, 0.0  ;;  %v849_v47 = vadd.f32 %v848_v39, %v847_v41  ;;  %v886_v48 = vadd.f32 %v885_v40, %v884_v42  ;;  %v1101_v39 = vld [vmem:[%s1549_s4] ss:$0 sm:$0xff] (!%p1099_p9)  ;;  %v1102_v41 = vld [vmem:[#allocation3] ss:$0 sm:$0xff] (!%p1099_p9) }
 0x12e   : > { %v806_v55 = vmax.f32 %v718_v49, 0.0  ;;  %v822_v56 = vmax.f32 %v782_v50, 0.0  ;;  %v854_v63 = vsel %vm826_vm3, %v807_v51, 0.0  ;;  %v891_v0 = vsel %vm826_vm3, %v823_v52, 0.0 }
 0x12f   : > { %v851_v53 = vadd.f32 %v850_v43, %v849_v47  ;;  %v888_v54 = vadd.f32 %v887_v44, %v886_v48  ;;  %v856_v2 = vsel %vm826_vm3, %v808_v57, 0.0  ;;  %v893_v3 = vsel %vm826_vm3, %v824_v58, 0.0 }
 0x130   : > { %v852_v59 = vsel %vm826_vm3, %v806_v55, 0.0  ;;  %v889_v60 = vsel %vm826_vm3, %v822_v56, 0.0  ;;  %v1284_v24 = vmov (!%p1099_p9), 0.0|0.0   ;;  %v1193_v25 = vpack.c.bf16 (!%p1099_p9), %v931_v22, %v930_v21 }
 0x131   : > { %v853_v61 = vadd.f32 %v852_v59, %v851_v53  ;;  %v890_v62 = vadd.f32 %v889_v60, %v888_v54  ;;  %1192 = vmatprep.subr.bf16.mxu0 (!%p1099_p9), %v1284_v24  ;;  %v1286_v27 = vmov (!%p1099_p9), 0.0   ;;  %v1196_v28 = vpack.c.bf16 (!%p1099_p9), %v933_v26, %v932_v23 }
 0x132   : > { %1189 = vmatprep.mubr.msk.f32.mxu0 (!%p1099_p9), %vm1285_vm6, %v1286_v27  ;;  %1194 = vmatpush3.bf16.msra.mxu0 (!%p1099_p9), %v1193_v25  ;;  %v1199_v31 = vpack.c.bf16 (!%p1099_p9), %v935_v30, %v934_v29  ;;  %v1202_v37 = vpack.c.bf16 (!%p1099_p9), %v937_v35, %v936_v34 }
 0x133   : > { %v855_v1 = vadd.f32 %v854_v63, %v853_v61  ;;  %v892_v38 = vadd.f32 %v891_v0, %v890_v62  ;;  %1195 = vmatprep.subr.bf16.mxu0 (!%p1099_p9), %v1284_v24 }
 0x135   : > { %v857_v4 = vadd.f32 %v856_v2, %v855_v1  ;;  %v894_v5 = vadd.f32 %v893_v3, %v892_v38 }
 0x136   : > { %1197 = vmatpush3.bf16.msra.mxu0 (!%p1099_p9), %v1196_v28 }
 0x137   : > { %v858_v6 = vrot.slane %v857_v4, 4  ;;  %v895_v7 = vrot.slane %v894_v5, 4  ;;  %1198 = vmatprep.subr.bf16.mxu0 (!%p1099_p9), %v1284_v24 }
 0x139   : > { %v859_v8 = vadd.f32 %v858_v6, %v857_v4  ;;  %v896_v9 = vadd.f32 %v895_v7, %v894_v5 }
 0x13a   : > { %1200 = vmatpush3.bf16.msra.mxu0 (!%p1099_p9), %v1199_v31 }
 0x13b   : > { %v860_v10 = vrot.slane %v859_v8, 2  ;;  %v897_v11 = vrot.slane %v896_v9, 2  ;;  %1201 = vmatprep.subr.bf16.mxu0 (!%p1099_p9), %v1284_v24 }
 0x13d   : > { %v861_v12 = vadd.f32 %v860_v10, %v859_v8  ;;  %v898_v13 = vadd.f32 %v897_v11, %v896_v9 }
 0x13e   : > { %1203 = vmatpush3.bf16.msra.mxu0 (!%p1099_p9), %v1202_v37 }
 0x13f   : > { %v862_v14 = vrot.slane %v861_v12, 1  ;;  %v899_v15 = vrot.slane %v898_v13, 1 }
 0x140   : > { %912 = sbr.rel (%p1099_p9) target bundleno = 553 (0x229), region = 97 }
 0x141   : > { %v863_v16 = vadd.f32 %v862_v14, %v861_v12  ;;  %v900_v18 = vadd.f32 %v899_v15, %v898_v13 }
 0x143   : > { %v904_v19 = vsel %vm903_vm4, %v900_v18, %v863_v16 }
 0x144   : > { %v906_v20 = vadd.f32 %v904_v19, %v825_v17 }
 0x146   : > { %908 = vst.msk [vmem:[#allocation2] sm:$0x3] %vm907_vm5, %v906_v20 }
 0x14d   : > { %v913_v32 = vld [vmem:[#allocation2] sm:$0x3] }
 0x14e   : > { %v921_v36 = vmul.f32 %v1100_v33, %v913_v32 }
 0x150   : > { %v929_v40 = vadd.f32 %v1101_v39, %v921_v36 }
 0x152   : > { %1190 = vmatmul.mubr.msk.f32.vlgmr.msra.gmra.mrb[0].mxu0 %vm826_vm3, %v929_v40 }
 0x225   : > { %v1014_v42 = vpop.f32.mrb[0].mxu0 }
 0x226   : > { %v1015_v43 = vadd.f32 %v1102_v41, %v1014_v42  ;;  %v1191_v44 = vpop.f32.mrb[1].mxu0 }
 0x228   : > { %1019 = vst.msk [vmem:[%s1552_s7] sm:$0x3] %vm1018_vm7, %v1015_v43 }
 0x229 PF: > { %p16_p10 = scmp.ge.s32.totalorder %s1347_s29, 4   ;;  %s1553_s26 = smov %s1277_s27 }
 0x22a   : > { %s1554_s27 = smov %s1356_s9  ;;  %s1555_s28 = smov %s1347_s29 }
 0x22b   :  { %18 = sbr.rel (!%p16_p10) target bundleno = 5 (0x5), region = 128 }

</bundles_post_ra>
